<compile_context>
chip_gen: v7x
topology: tpu7x:2x2x1
jax: 0.10.0
libtpu: 0.0.40
codegen_flags: <defaults>
</compile_context>

<pallas_src>
import jax
import jax.numpy as jnp
from jax.experimental import pallas as pl
from jax.experimental.pallas import tpu as pltpu

KERNEL_SIZE = 5  # must be odd, as in DLinear


# --------------------------------------------------------------------------- #
# Kernels
# --------------------------------------------------------------------------- #
def _make_flat_kernel(L, C, kernel_size, bt, lc):
    """Fast path: circular rolls + narrow edge fix-up. Requires L >= kernel_size."""
    pad = (kernel_size - 1) // 2
    inv_k = 1.0 / kernel_size
    hw = pad * C  # lanes per edge region

    def kernel(x_ref, res_ref, mean_ref):
        xf = x_ref[...].astype(jnp.float32)          # (bt, L*C), math in f32

        # ---- bulk: circular moving sum (correct for interior rows) ----------
        acc = xf                                     # d = 0 tap
        for d in range(1, pad + 1):
            s = d * C
            acc = acc + pltpu.roll(xf, shift=s, axis=1)       # x[(i-d) mod L]
            acc = acc + pltpu.roll(xf, shift=lc - s, axis=1)  # x[(i+d) mod L]

        mean = acc * inv_k
        mean_ref[...] = mean.astype(mean_ref.dtype)
        res_ref[...] = (xf - mean).astype(res_ref.dtype)

        # ---- narrow edge fix-up: only first/last pad rows are re-stored ------
        if pad > 0:
            x0 = xf[:, :C]                           # first time step, (bt, C)
            xl = xf[:, lc - C:]                      # last  time step, (bt, C)
            suf = jnp.zeros_like(x0)                 # sum of last  s rows
            pre = jnp.zeros_like(x0)                 # sum of first s rows
            for s in range(1, pad + 1):
                suf = suf + xf[:, (L - s) * C:(L - s + 1) * C]
                pre = pre + xf[:, (s - 1) * C:s * C]

                # head row i = pad - s:  circular wrapped (p-i)=s trailing rows;
                # replicate padding wants s copies of x[0] instead.
                ih = pad - s
                hm = (acc[:, ih * C:(ih + 1) * C] + float(s) * x0 - suf) * inv_k
                mean_ref[:, ih * C:(ih + 1) * C] = hm.astype(mean_ref.dtype)
                res_ref[:, ih * C:(ih + 1) * C] = (
                    xf[:, ih * C:(ih + 1) * C] - hm).astype(res_ref.dtype)

                # tail row i = L-1-pad+s: circular wrapped s leading rows;
                # replicate padding wants s copies of x[L-1] instead.
                it = L - 1 - pad + s
                tm = (acc[:, it * C:(it + 1) * C] + float(s) * xl - pre) * inv_k
                mean_ref[:, it * C:(it + 1) * C] = tm.astype(mean_ref.dtype)
                res_ref[:, it * C:(it + 1) * C] = (
                    xf[:, it * C:(it + 1) * C] - tm).astype(res_ref.dtype)

    return kernel


def _make_clamped_kernel(L, C, kernel_size, bt, lc):
    """Fallback for degenerate L < kernel_size (chained-where replicate clamp)."""
    pad = (kernel_size - 1) // 2
    inv_k = 1.0 / kernel_size

    def kernel(x_ref, res_ref, mean_ref):
        xf = x_ref[...].astype(jnp.float32)
        col = jax.lax.broadcasted_iota(jnp.int32, (bt, lc), 1)
        acc = xf
        past = xf
        fut = xf
        for d in range(1, pad + 1):
            s = (d * C) % lc
            r_past = pltpu.roll(xf, shift=s, axis=1)
            r_fut = pltpu.roll(xf, shift=(lc - s) % lc, axis=1)
            past = jnp.where(col >= d * C, r_past, past)        # rows i <  d  -> x[0]
            fut = jnp.where(col < (L - d) * C, r_fut, fut)      # rows i >= L-d -> x[L-1]
            acc = acc + past + fut
        mean = acc * inv_k
        mean_ref[...] = mean.astype(mean_ref.dtype)
        res_ref[...] = (xf - mean).astype(res_ref.dtype)

    return kernel


# --------------------------------------------------------------------------- #
# Tiling helpers
# --------------------------------------------------------------------------- #
def _vmem_capacity_bytes():
    try:
        info = pltpu.get_tpu_info()
        for name in ("vmem_capacity_bytes", "vmem_size_bytes", "vmem_bytes"):
            v = getattr(info, name, None)
            if v:
                return int(v)
    except Exception:
        pass
    return 64 * 1024 * 1024  # conservative (v7x per-TC); safe everywhere


def _budgets(target_block_bytes):
    cap = _vmem_capacity_bytes()
    if cap >= 96 * 1024 * 1024:           # v5e / v6e: 128 MiB physical VMEM
        vmem_limit = 64 * 1024 * 1024
        tgt = 4 * 1024 * 1024
    else:                                  # v7x: 64 MiB per TensorCore
        vmem_limit = 40 * 1024 * 1024
        tgt = 2 * 1024 * 1024
    if target_block_bytes is not None:
        tgt = int(target_block_bytes)
    return tgt, vmem_limit


def _min_block_rows(b):
    # smallest legal sublane extent for a batch tile: full dim if <= 8, else 8
    return b if b <= 8 else 8


def _pick_batch_tile(B, row_bytes, target_block_bytes, sub):
    """Batch rows per block: fill ~target bytes, keep >=4 grid steps when possible,
    round to the dtype's sublane packing (8 f32 / 16 bf16 / 32 int8)."""
    if B <= 8:
        return B                                   # full batch (legal: equals array dim)
    bt = max(1, target_block_bytes // max(1, row_bytes))
    bt = min(bt, B, max(8, pl.cdiv(B, 4)))         # >=4 steps -> both v7x TCs pipelined
    step = sub if (bt >= sub and B >= sub) else 8
    bt = max(8, (bt // step) * step)
    return bt


# --------------------------------------------------------------------------- #
# Wrapper
# --------------------------------------------------------------------------- #
def _series_decomp_flat(x, kernel_size, target_block_bytes, vmem_limit, sub):
    B, L, C = x.shape
    LC = L * C
    x_flat = x.reshape(B, LC)                      # free reshape -> lane-dense view

    row_bytes = LC * x.dtype.itemsize
    Bt = _pick_batch_tile(B, row_bytes, target_block_bytes, sub)
    grid_b = pl.cdiv(B, Bt)

    blk = pl.BlockSpec((Bt, LC), lambda i: (i, 0))
    if L >= kernel_size:
        kernel = _make_flat_kernel(L, C, kernel_size, Bt, LC)
    else:
        kernel = _make_clamped_kernel(L, C, kernel_size, Bt, LC)

    res, mean = pl.pallas_call(
        kernel,
        out_shape=(
            jax.ShapeDtypeStruct((B, LC), x.dtype),
            jax.ShapeDtypeStruct((B, LC), x.dtype),
        ),
        grid=(grid_b,),
        in_specs=[blk],
        out_specs=(blk, blk),
        compiler_params=pltpu.CompilerParams(
            dimension_semantics=("parallel",),
            vmem_limit_bytes=vmem_limit,
        ),
    )(x_flat)
    return res.reshape(B, L, C), mean.reshape(B, L, C)


def series_decomp(x, kernel_size=KERNEL_SIZE, *, target_block_bytes=None):
    """x: (B, L, C) -> (res, moving_mean), both (B, L, C)."""
    if kernel_size % 2 != 1:
        raise ValueError("kernel_size must be odd so output length == input length")
    B, L, C = x.shape
    itemsize = x.dtype.itemsize
    sub = max(8, 32 // max(1, itemsize))           # sublane packing for this dtype

    tgt, vmem_limit = _budgets(target_block_bytes)

    # Channel-split fallback: if even the minimum legal batch tile exceeds the
    # per-block budget (small B with huge L*C), split C into tiles folded into
    # the batch axis -- channels are independent of the time average.
    c_split = 1
    for split in range(1, C + 1):
        if C % split:
            continue
        b_eff = B * split
        if _min_block_rows(b_eff) * L * (C // split) * itemsize <= tgt:
            c_split = split
            break
    else:
        c_split = C  # TODO(synk): tile the time axis with halos for huge L, tiny C

    if c_split > 1:
        Ct = C // c_split
        xw = (x.reshape(B, L, c_split, Ct)
               .transpose(0, 2, 1, 3)
               .reshape(B * c_split, L, Ct))
        res, mean = _series_decomp_flat(xw, kernel_size, tgt, vmem_limit, sub)
        res = (res.reshape(B, c_split, L, Ct)
                  .transpose(0, 2, 1, 3).reshape(B, L, C))
        mean = (mean.reshape(B, c_split, L, Ct)
                    .transpose(0, 2, 1, 3).reshape(B, L, C))
        return res, mean

    return _series_decomp_flat(x, kernel_size, tgt, vmem_limit, sub)


# --------------------------------------------------------------------------- #
# Pure-JAX reference + tests
# --------------------------------------------------------------------------- #
def _reference(x, kernel_size=KERNEL_SIZE):
    pad = (kernel_size - 1) // 2
    xp = jnp.concatenate(
        [jnp.repeat(x[:, 0:1, :], pad, axis=1),
         x,
         jnp.repeat(x[:, -1:, :], pad, axis=1)], axis=1)
    L = x.shape[1]
    mean = sum(xp[:, j:j + L, :] for j in range(kernel_size)) / kernel_size
    return x - mean, mean


if __name__ == "__main__":
    key = jax.random.PRNGKey(0)
    k0, k1, k2, k3 = jax.random.split(key, 4)

    # 1) Small shape consistent with the module's (batch, seq, channel) input.
    x = jax.random.normal(k0, (2, 16, 8), dtype=jnp.float32)
    res, mean = series_decomp(x)
    jax.block_until_ready((res, mean))
    rr, mr = _reference(x)
    assert jnp.allclose(mean, mr, atol=1e-5, rtol=1e-5)
    assert jnp.allclose(res, rr, atol=1e-5, rtol=1e-5)

    # 2) Batch-tiled grid (Bt=8 -> 2 parallel grid steps).
    x2 = jax.random.normal(k1, (16, 16, 8), dtype=jnp.float32)
    res2, mean2 = series_decomp(x2)
    jax.block_until_ready((res2, mean2))
    rr2, mr2 = _reference(x2)
    assert jnp.allclose(mean2, mr2, atol=1e-5, rtol=1e-5)
    assert jnp.allclose(res2, rr2, atol=1e-5, rtol=1e-5)

    # 3) Channel-split fallback path (forced tiny per-block budget).
    x3 = jax.random.normal(k2, (2, 32, 16), dtype=jnp.float32)
    res3, mean3 = series_decomp(x3, target_block_bytes=2048)
    jax.block_until_ready((res3, mean3))
    rr3, mr3 = _reference(x3)
    assert jnp.allclose(mean3, mr3, atol=1e-5, rtol=1e-5)
    assert jnp.allclose(res3, rr3, atol=1e-5, rtol=1e-5)

    # 4) bf16 input (f32 accumulation inside the kernel; bf16-appropriate tolerance).
    x4 = jax.random.normal(k3, (4, 24, 8), dtype=jnp.bfloat16)
    res4, mean4 = series_decomp(x4)
    jax.block_until_ready((res4, mean4))
    rr4, mr4 = _reference(x4.astype(jnp.float32))
    assert jnp.allclose(mean4.astype(jnp.float32), mr4, atol=5e-2)
    assert jnp.allclose(res4.astype(jnp.float32), rr4, atol=5e-2)

    print("KERNEL_OK")
</pallas_src>

<mosaic_0001>
module attributes {stable_mosaic.version = 11 : i64} {
  func.func @kernel(%arg0: i32, %arg1: memref<2x128xf32, #tpu.memory_space<vmem>>, %arg2: memref<2x128xf32, #tpu.memory_space<vmem>>, %arg3: memref<2x128xf32, #tpu.memory_space<vmem>>) attributes {dimension_semantics = [#tpu.dimension_semantics<parallel>], iteration_bounds = array<i64: 1>, scalar_prefetch = 0 : i64, scratch_operands = 0 : i64, tpu.core_type = #tpu.core_type<tc>, window_params = [{transform_indices = @transform_0, window_bounds = array<i64: 2, 128>}, {transform_indices = @transform_1, window_bounds = array<i64: 2, 128>}, {transform_indices = @transform_2, window_bounds = array<i64: 2, 128>}]} {
    %c0 = arith.constant 0 : index
    %c0_0 = arith.constant 0 : index
    %0 = vector.load %arg1[%c0, %c0_0] : memref<2x128xf32, #tpu.memory_space<vmem>>, vector<2x128xf32>
    %c8_i32 = arith.constant 8 : i32
    %1 = tpu.dynamic_rotate %0 by %c8_i32 dim 1 : vector<2x128xf32>, i32 -> vector<2x128xf32>
    %2 = arith.addf %0, %1 : vector<2x128xf32>
    %c120_i32 = arith.constant 120 : i32
    %3 = tpu.dynamic_rotate %0 by %c120_i32 dim 1 : vector<2x128xf32>, i32 -> vector<2x128xf32>
    %4 = arith.addf %2, %3 : vector<2x128xf32>
    %c16_i32 = arith.constant 16 : i32
    %5 = tpu.dynamic_rotate %0 by %c16_i32 dim 1 : vector<2x128xf32>, i32 -> vector<2x128xf32>
    %6 = arith.addf %4, %5 : vector<2x128xf32>
    %c112_i32 = arith.constant 112 : i32
    %7 = tpu.dynamic_rotate %0 by %c112_i32 dim 1 : vector<2x128xf32>, i32 -> vector<2x128xf32>
    %8 = arith.addf %6, %7 : vector<2x128xf32>
    %cst = arith.constant 2.000000e-01 : f32
    %9 = vector.broadcast %cst : f32 to vector<2x128xf32>
    %10 = arith.mulf %8, %9 : vector<2x128xf32>
    %c0_1 = arith.constant 0 : index
    %c0_2 = arith.constant 0 : index
    %11 = vector.load %arg3[%c0_1, %c0_2] : memref<2x128xf32, #tpu.memory_space<vmem>>, vector<2x128xf32>
    tpu.vector_store %arg3[%c0_1, %c0_2], %10 {strides = array<i32>} : memref<2x128xf32, #tpu.memory_space<vmem>>, vector<2x128xf32>,
    %12 = arith.subf %0, %10 : vector<2x128xf32>
    %c0_3 = arith.constant 0 : index
    %c0_4 = arith.constant 0 : index
    %13 = vector.load %arg2[%c0_3, %c0_4] : memref<2x128xf32, #tpu.memory_space<vmem>>, vector<2x128xf32>
    tpu.vector_store %arg2[%c0_3, %c0_4], %12 {strides = array<i32>} : memref<2x128xf32, #tpu.memory_space<vmem>>, vector<2x128xf32>,
    %14 = vector.extract_strided_slice %0 {offsets = [0, 0], sizes = [2, 8], strides = [1, 1]} : vector<2x128xf32> to vector<2x8xf32>
    %15 = vector.extract_strided_slice %0 {offsets = [0, 120], sizes = [2, 8], strides = [1, 1]} : vector<2x128xf32> to vector<2x8xf32>
    %cst_5 = arith.constant 0.000000e+00 : f32
    %16 = vector.broadcast %cst_5 : f32 to vector<2x8xf32>
    %cst_6 = arith.constant 0.000000e+00 : f32
    %17 = vector.broadcast %cst_6 : f32 to vector<2x8xf32>
    %18 = vector.extract_strided_slice %0 {offsets = [0, 120], sizes = [2, 8], strides = [1, 1]} : vector<2x128xf32> to vector<2x8xf32>
    %19 = arith.addf %16, %18 : vector<2x8xf32>
    %20 = vector.extract_strided_slice %0 {offsets = [0, 0], sizes = [2, 8], strides = [1, 1]} : vector<2x128xf32> to vector<2x8xf32>
    %21 = arith.addf %17, %20 : vector<2x8xf32>
    %22 = vector.extract_strided_slice %8 {offsets = [0, 8], sizes = [2, 8], strides = [1, 1]} : vector<2x128xf32> to vector<2x8xf32>
    %cst_7 = arith.constant 1.000000e+00 : f32
    %23 = vector.broadcast %cst_7 : f32 to vector<2x8xf32>
    %24 = arith.mulf %23, %14 : vector<2x8xf32>
    %25 = arith.addf %22, %24 : vector<2x8xf32>
    %26 = arith.subf %25, %19 : vector<2x8xf32>
    %cst_8 = arith.constant 2.000000e-01 : f32
    %27 = vector.broadcast %cst_8 : f32 to vector<2x8xf32>
    %28 = arith.mulf %26, %27 : vector<2x8xf32>
    %c0_9 = arith.constant 0 : index
    %c8 = arith.constant 8 : index
    %29 = vector.load %arg3[%c0_9, %c8] : memref<2x128xf32, #tpu.memory_space<vmem>>, vector<2x8xf32>
    tpu.vector_store %arg3[%c0_9, %c8], %28 {strides = array<i32>} : memref<2x128xf32, #tpu.memory_space<vmem>>, vector<2x8xf32>,
    %30 = vector.extract_strided_slice %0 {offsets = [0, 8], sizes = [2, 8], strides = [1, 1]} : vector<2x128xf32> to vector<2x8xf32>
    %31 = arith.subf %30, %28 : vector<2x8xf32>
    %c0_10 = arith.constant 0 : index
    %c8_11 = arith.constant 8 : index
    %32 = vector.load %arg2[%c0_10, %c8_11] : memref<2x128xf32, #tpu.memory_space<vmem>>, vector<2x8xf32>
    tpu.vector_store %arg2[%c0_10, %c8_11], %31 {strides = array<i32>} : memref<2x128xf32, #tpu.memory_space<vmem>>, vector<2x8xf32>,
    %33 = vector.extract_strided_slice %8 {offsets = [0, 112], sizes = [2, 8], strides = [1, 1]} : vector<2x128xf32> to vector<2x8xf32>
    %cst_12 = arith.constant 1.000000e+00 : f32
    %34 = vector.broadcast %cst_12 : f32 to vector<2x8xf32>
    %35 = arith.mulf %34, %15 : vector<2x8xf32>
    %36 = arith.addf %33, %35 : vector<2x8xf32>
    %37 = arith.subf %36, %21 : vector<2x8xf32>
    %cst_13 = arith.constant 2.000000e-01 : f32
    %38 = vector.broadcast %cst_13 : f32 to vector<2x8xf32>
    %39 = arith.mulf %37, %38 : vector<2x8xf32>
    %c0_14 = arith.constant 0 : index
    %c112 = arith.constant 112 : index
    %40 = vector.load %arg3[%c0_14, %c112] : memref<2x128xf32, #tpu.memory_space<vmem>>, vector<2x8xf32>
    tpu.vector_store %arg3[%c0_14, %c112], %39 {strides = array<i32>} : memref<2x128xf32, #tpu.memory_space<vmem>>, vector<2x8xf32>,
    %41 = vector.extract_strided_slice %0 {offsets = [0, 112], sizes = [2, 8], strides = [1, 1]} : vector<2x128xf32> to vector<2x8xf32>
    %42 = arith.subf %41, %39 : vector<2x8xf32>
    %c0_15 = arith.constant 0 : index
    %c112_16 = arith.constant 112 : index
    %43 = vector.load %arg2[%c0_15, %c112_16] : memref<2x128xf32, #tpu.memory_space<vmem>>, vector<2x8xf32>
    tpu.vector_store %arg2[%c0_15, %c112_16], %42 {strides = array<i32>} : memref<2x128xf32, #tpu.memory_space<vmem>>, vector<2x8xf32>,
    %44 = vector.extract_strided_slice %0 {offsets = [0, 112], sizes = [2, 8], strides = [1, 1]} : vector<2x128xf32> to vector<2x8xf32>
    %45 = arith.addf %19, %44 : vector<2x8xf32>
    %46 = vector.extract_strided_slice %0 {offsets = [0, 8], sizes = [2, 8], strides = [1, 1]} : vector<2x128xf32> to vector<2x8xf32>
    %47 = arith.addf %21, %46 : vector<2x8xf32>
    %48 = vector.extract_strided_slice %8 {offsets = [0, 0], sizes = [2, 8], strides = [1, 1]} : vector<2x128xf32> to vector<2x8xf32>
    %cst_17 = arith.constant 2.000000e+00 : f32
    %49 = vector.broadcast %cst_17 : f32 to vector<2x8xf32>
    %50 = arith.mulf %49, %14 : vector<2x8xf32>
    %51 = arith.addf %48, %50 : vector<2x8xf32>
    %52 = arith.subf %51, %45 : vector<2x8xf32>
    %cst_18 = arith.constant 2.000000e-01 : f32
    %53 = vector.broadcast %cst_18 : f32 to vector<2x8xf32>
    %54 = arith.mulf %52, %53 : vector<2x8xf32>
    %c0_19 = arith.constant 0 : index
    %c0_20 = arith.constant 0 : index
    %55 = vector.load %arg3[%c0_19, %c0_20] : memref<2x128xf32, #tpu.memory_space<vmem>>, vector<2x8xf32>
    tpu.vector_store %arg3[%c0_19, %c0_20], %54 {strides = array<i32>} : memref<2x128xf32, #tpu.memory_space<vmem>>, vector<2x8xf32>,
    %56 = vector.extract_strided_slice %0 {offsets = [0, 0], sizes = [2, 8], strides = [1, 1]} : vector<2x128xf32> to vector<2x8xf32>
    %57 = arith.subf %56, %54 : vector<2x8xf32>
    %c0_21 = arith.constant 0 : index
    %c0_22 = arith.constant 0 : index
    %58 = vector.load %arg2[%c0_21, %c0_22] : memref<2x128xf32, #tpu.memory_space<vmem>>, vector<2x8xf32>
    tpu.vector_store %arg2[%c0_21, %c0_22], %57 {strides = array<i32>} : memref<2x128xf32, #tpu.memory_space<vmem>>, vector<2x8xf32>,
    %59 = vector.extract_strided_slice %8 {offsets = [0, 120], sizes = [2, 8], strides = [1, 1]} : vector<2x128xf32> to vector<2x8xf32>
    %cst_23 = arith.constant 2.000000e+00 : f32
    %60 = vector.broadcast %cst_23 : f32 to vector<2x8xf32>
    %61 = arith.mulf %60, %15 : vector<2x8xf32>
    %62 = arith.addf %59, %61 : vector<2x8xf32>
    %63 = arith.subf %62, %47 : vector<2x8xf32>
    %cst_24 = arith.constant 2.000000e-01 : f32
    %64 = vector.broadcast %cst_24 : f32 to vector<2x8xf32>
    %65 = arith.mulf %63, %64 : vector<2x8xf32>
    %c0_25 = arith.constant 0 : index
    %c120 = arith.constant 120 : index
    %66 = vector.load %arg3[%c0_25, %c120] : memref<2x128xf32, #tpu.memory_space<vmem>>, vector<2x8xf32>
    tpu.vector_store %arg3[%c0_25, %c120], %65 {strides = array<i32>} : memref<2x128xf32, #tpu.memory_space<vmem>>, vector<2x8xf32>,
    %67 = vector.extract_strided_slice %0 {offsets = [0, 120], sizes = [2, 8], strides = [1, 1]} : vector<2x128xf32> to vector<2x8xf32>
    %68 = arith.subf %67, %65 : vector<2x8xf32>
    %c0_26 = arith.constant 0 : index
    %c120_27 = arith.constant 120 : index
    %69 = vector.load %arg2[%c0_26, %c120_27] : memref<2x128xf32, #tpu.memory_space<vmem>>, vector<2x8xf32>
    tpu.vector_store %arg2[%c0_26, %c120_27], %68 {strides = array<i32>} : memref<2x128xf32, #tpu.memory_space<vmem>>, vector<2x8xf32>,
    return
  }
  func.func @transform_0(%arg0: i32) -> (i32, i32) {
    %c0_i32 = arith.constant 0 : i32
    %c0_i32_0 = arith.constant 0 : i32
    return %arg0, %c0_i32 : i32, i32
  }
  func.func @transform_1(%arg0: i32) -> (i32, i32) {
    %c0_i32 = arith.constant 0 : i32
    %c0_i32_0 = arith.constant 0 : i32
    return %arg0, %c0_i32 : i32, i32
  }
  func.func @transform_2(%arg0: i32) -> (i32, i32) {
    %c0_i32 = arith.constant 0 : i32
    %c0_i32_0 = arith.constant 0 : i32
    return %arg0, %c0_i32 : i32, i32
  }
}

</mosaic_0001>

<bundles_post_ra>
// kernel: tpu_custom_call.1
= control target key start
LH: loop header
LB: loop body
LE: loop exit
PB: predicated region body
PF: predicated region fallthrough
CT: control target
= control target key end

     0   :  { %8 = vsyncpa [#allocation3], 0  ;;  %s281_s0 = inlined_call_operand.hbm [shape: f32[2,128], index: 0, kind: input, shape index: {}]   ;;  %s282_s1 = inlined_call_operand.hbm [shape: f32[2,128], index: 1, kind: output, shape index: {0}]   ;;  %s283_s2 = inlined_call_operand.hbm [shape: f32[2,128], index: 2, kind: output, shape index: {1}]  }
   0x1   :  { %9 = vsyncpa [#allocation4], 0 }
   0x2   :  { %10 = vsyncpa [#allocation7], 0  ;;  %s202_s9 = smov [#allocation2]   ;;  %s130_s13 = scalar_lea.hbm %s281_s0, 32 }
   0x3   :  { %s17_s10 = sshll.u32 %s202_s9, 4  ;;  %p131_p0 = scmp.ne.s32.totalorder %s281_s0, %s130_s13  ;;  %s18_s10 = int_to_ptr.vmem [resolvable:$true] %s17_s10 }
   0x4   :  { %p134_p1 = scmp.lt.u32.totalorder %s130_s13, %s281_s0 }
   0x6   :  { %p136_p2 = pnand %p134_p1, %p131_p0 }
   0x8   :  { %139 = shalt.err (!%p136_p2)
}
   0x9   :  { %s140_s18 = scalar_lea.vmem %s18_s10, 32  ;;  %p145_p4 = scmp.lt.s32.totalorder %s18_s10, %s18_s10 }
   0xa   :  { %p141_p3 = scmp.ne.s32.totalorder %s18_s10, %s140_s18  ;;  %p146_p5 = scmp.lt.s32.totalorder %s140_s18, %s140_s18 }
   0xc   :  { %p147_p6 = por %p146_p5, %p145_p4 }
   0xe   :  { %p148_p7 = pnand %p147_p6, %p141_p3 }
  0x10   :  { %151 = shalt.err (!%p148_p7)
}
  0x11   :  { %20 = dma.hbm_to_vmem [thread:$0]  %s281_s0, 32, %s18_s10, [#allocation3]  }
  0x12   :  { %196 = dma.done.wait [#allocation3], 32  }
  0x13   :  { %197 = vsyncadd [#allocation3], 4294967264  ;;  %v236_v0 = vld [vmem:[#allocation2] sm:$0x3]  ;;  %s203_s21 = smov 8   ;;  %s204_s22 = smov 120  }
  0x14   :  { %43 = vrot.lane.b32.xlu0 %v236_v0, %s203_s21  ;;  %25 = vrot.lane.b32.xlu1 %v236_v0, %s203_s21  ;;  %s205_s23 = smov 16   ;;  %s206_s24 = smov 112   ;;  %vm53_vm0 = vcmask 123968   ;;  %vm66_vm1 = vcmask 976768   ;;  %v72_v25 = vmul.f32 2.0, %v236_v0  ;;  %vm80_vm2 = vcmask 58368  }
  0x15   :  { %s207_s0 = smov [#allocation6]   ;;  %vm90_vm3 = vcmask 1042368   ;;  %s208_s26 = smov [#allocation5]  }
  0x16   :  { %s110_s25 = sshll.u32 %s207_s0, 4  ;;  %s100_s27 = sshll.u32 %s208_s26, 4  ;;  %s111_s25 = int_to_ptr.vmem [resolvable:$true] %s110_s25  ;;  %s101_s27 = int_to_ptr.vmem [resolvable:$true] %s100_s27 }
  0x17   :  { %s152_s28 = scalar_lea.vmem %s111_s25, 32  ;;  %p157_p9 = scmp.lt.s32.totalorder %s111_s25, %s111_s25 }
  0x18   :  { %57 = vrot.lane.b32.xlu0 %v236_v0, %s204_s22  ;;  %28 = vrot.lane.b32.xlu1 %v236_v0, %s204_s22  ;;  %p153_p8 = scmp.ne.s32.totalorder %s111_s25, %s152_s28  ;;  %p158_p10 = scmp.lt.s32.totalorder %s152_s28, %s152_s28 }
  0x1a   :  { %p159_p11 = por %p158_p10, %p157_p9 }
  0x1c   :  { %31 = vrot.lane.b32.xlu0 %v236_v0, %s205_s23  ;;  %34 = vrot.lane.b32.xlu1 %v236_v0, %s206_s24  ;;  %p160_p12 = pnand %p159_p11, %p153_p8 }
  0x20   :  { %61 = vrot.lane.b32.xlu1 %v236_v0, %s206_s24  ;;  %48 = vrot.lane.b32.xlu0 %v236_v0, %s205_s23 }
  0x86   :  { %v44_v1 = vpop.permute.xlu0 %43  ;;  %v26_v2 = vpop.permute.xlu1 %25 }
  0x87   :  { %v70_v3 = vadd.f32 %v44_v1, %v236_v0  ;;  %v27_v4 = vadd.f32 %v26_v2, %v236_v0 }
  0x89   :  { %75 = vrot.lane.b32.xlu0 %v70_v3, %s203_s21 }
  0x8a   :  { %v58_v5 = vpop.permute.xlu0 %57  ;;  %v29_v6 = vpop.permute.xlu1 %28 }
  0x8b   :  { %v71_v7 = vadd.f32 %v58_v5, %v236_v0  ;;  %v30_v8 = vadd.f32 %v29_v6, %v27_v4 }
  0x8d   :  { %85 = vrot.lane.b32.xlu1 %v71_v7, %s204_s22 }
  0x8e   :  { %v32_v9 = vpop.permute.xlu0 %31  ;;  %v35_v10 = vpop.permute.xlu1 %34 }
  0x8f   :  { %v33_v11 = vadd.f32 %v32_v9, %v30_v8 }
  0x91   :  { %v36_v12 = vadd.f32 %v35_v10, %v33_v11 }
  0x92   :  { %v62_v13 = vpop.permute.xlu1 %61  ;;  %v49_v14 = vpop.permute.xlu0 %48 }
  0x93   :  { %v37_v15 = vmul.f32 0.2, %v36_v12  ;;  %v60_v16 = vadd.f32 %v58_v5, %v36_v12  ;;  %v46_v17 = vadd.f32 %v44_v1, %v36_v12  ;;  %v73_v26 = vadd.f32 %v72_v25, %v36_v12 }
  0x95   :  { %38 = vst [vmem:[#allocation6] sm:$0x3] %v37_v15  ;;  %v39_v18 = vsub.f32 %v236_v0, %v37_v15  ;;  %v64_v19 = vsub.f32 %v60_v16, %v62_v13  ;;  %v51_v20 = vsub.f32 %v46_v17, %v49_v14 }
  0x97   :  { %40 = vst [vmem:[#allocation5] sm:$0x3] %v39_v18  ;;  %v65_v21 = vmul.f32 0.2, %v64_v19  ;;  %v52_v22 = vmul.f32 0.2, %v51_v20 }
  0x99   :  { %v68_v23 = vsub.f32 %v236_v0, %v65_v21  ;;  %54 = vst.msk [vmem:[#allocation6] sm:$0x3] %vm53_vm0, %v52_v22  ;;  %v55_v24 = vsub.f32 %v236_v0, %v52_v22 }
  0x9a   :  { %67 = vst.msk [vmem:[#allocation6] sm:$0x3] %vm66_vm1, %v65_v21 }
  0x9b   :  { %56 = vst.msk [vmem:[#allocation5] sm:$0x3] %vm53_vm0, %v55_v24 }
  0x9c   :  { %69 = vst.msk [vmem:[#allocation5] sm:$0x3] %vm66_vm1, %v68_v23 }
  0xfb   :  { %v76_v27 = vpop.permute.xlu0 %75 }
  0xfc   :  { %v78_v28 = vsub.f32 %v73_v26, %v76_v27 }
  0xfe   :  { %v79_v29 = vmul.f32 0.2, %v78_v28 }
  0xff   :  { %v86_v30 = vpop.permute.xlu1 %85 }
 0x100   :  { %v82_v31 = vsub.f32 %v236_v0, %v79_v29  ;;  %v88_v32 = vsub.f32 %v73_v26, %v86_v30  ;;  %81 = vst.msk [vmem:[#allocation6] sm:$0x3] %vm80_vm2, %v79_v29 }
 0x102   :  { %v89_v33 = vmul.f32 0.2, %v88_v32  ;;  %83 = vst.msk [vmem:[#allocation5] sm:$0x3] %vm80_vm2, %v82_v31 }
 0x104   :  { %v92_v34 = vsub.f32 %v236_v0, %v89_v33  ;;  %91 = vst.msk [vmem:[#allocation6] sm:$0x3] %vm90_vm3, %v89_v33 }
 0x105   :  { %163 = shalt.err (!%p160_p12)
}
 0x106   :  { %s164_s3 = scalar_lea.hbm %s283_s2, 32 }
 0x107   :  { %p165_p13 = scmp.ne.s32.totalorder %s283_s2, %s164_s3  ;;  %p168_p0 = scmp.lt.u32.totalorder %s164_s3, %s283_s2 }
 0x109   :  { %p170_p1 = pnand %p168_p0, %p165_p13 }
 0x10b   :  { %173 = shalt.err (!%p170_p1)
}
 0x10c   :  { %113 = dma.vmem_to_hbm [thread:$0]  %s111_s25, 32, %s283_s2, [#allocation7]   ;;  %93 = vst.msk [vmem:[#allocation5] sm:$0x3] %vm90_vm3, %v92_v34 }
 0x10d   :  { %s174_s10 = scalar_lea.vmem %s101_s27, 32  ;;  %p179_p3 = scmp.lt.s32.totalorder %s101_s27, %s101_s27 }
 0x10e   :  { %p175_p2 = scmp.ne.s32.totalorder %s101_s27, %s174_s10  ;;  %p180_p4 = scmp.lt.s32.totalorder %s174_s10, %s174_s10 }
 0x110   :  { %p181_p5 = por %p180_p4, %p179_p3 }
 0x112   :  { %p182_p6 = pnand %p181_p5, %p175_p2 }
 0x114   :  { %185 = shalt.err (!%p182_p6)
}
 0x115   :  { %s186_s13 = scalar_lea.hbm %s282_s1, 32 }
 0x116   :  { %p187_p7 = scmp.ne.s32.totalorder %s282_s1, %s186_s13  ;;  %p190_p8 = scmp.lt.u32.totalorder %s186_s13, %s282_s1 }
 0x118   :  { %p192_p9 = pnand %p190_p8, %p187_p7 }
 0x11a   :  { %195 = shalt.err (!%p192_p9)
}
 0x11b   :  { %103 = dma.vmem_to_hbm [thread:$0]  %s101_s27, 32, %s282_s1, [#allocation4]  }
 0x11c   :  { %198 = dma.done.wait [#allocation4], 32  }
 0x11d   :  { %199 = vsyncadd [#allocation4], 4294967264 }
 0x11e   :  { %200 = dma.done.wait [#allocation7], 32  }
 0x11f   :  { %201 = vsyncadd [#allocation7], 4294967264 }
 0x120   :  { %120 = vsyncpa [#allocation3], 1 }
 0x121   :  { %121 = vsyncpa [#allocation4], 1 }
 0x122   :  { %122 = vsyncpa [#allocation7], 1 }

</bundles_post_ra>
